<compile_context>
chip_gen: v6e
topology: v6e:2x2x1
jax: 0.10.0
libtpu: 0.0.40
codegen_flags: <defaults>
</compile_context>

<pallas_src>
import jax
import jax.numpy as jnp
from jax.experimental import pallas as pl
from jax.experimental.pallas import tpu as pltpu


def _planar_nf_kernel(w_ref, u_ref, b_ref, z_ref, z_out_ref, ld_ref):
    """One batch tile, all K planar flows chained in-kernel.

    w_ref, u_ref : SMEM (K*dim,) f32   -- per-flow weights / scales (flattened)
    b_ref        : SMEM (K,)     f32   -- per-flow biases
    z_ref        : VMEM (dim, TB) f32  -- batch tile, batch on lanes
    z_out_ref    : VMEM (dim, TB) f32
    ld_ref       : VMEM (K, TB)  f32   -- lane-dense log|det J| per flow
    """
    dim = z_ref.shape[0]
    K = ld_ref.shape[0]

    # Each feature is one sublane row of shape (1, TB); batch fills the lanes.
    z_rows = [z_ref[d:d + 1, :] for d in range(dim)]
    ld_rows = []

    for k in range(K):  # static unroll over flows
        # Scalar parameters from SMEM (sreg splats -- no masked VMEM loads).
        w = [w_ref[k * dim + d] for d in range(dim)]
        u = [u_ref[k * dim + d] for d in range(dim)]
        b = b_ref[k]

        # f_z = z @ w^T + b as a pure VPU expression (no XLU reduce).
        f_z = w[0] * z_rows[0]
        for d in range(1, dim):
            f_z = f_z + w[d] * z_rows[d]
        f_z = f_z + b
        t = jnp.tanh(f_z)                       # (1, TB) -> EUP

        # log|det J| at the pre-update z:
        #   det_grad = 1 + ((1 - t^2) * w) . u = 1 + (1 - t^2) * (w . u)
        wu = w[0] * u[0]
        for d in range(1, dim):
            wu = wu + w[d] * u[d]               # scalar, computed once per flow
        det_grad = 1.0 + (1.0 - t * t) * wu     # (1, TB)
        ld_rows.append(jnp.log(jnp.abs(det_grad) + 1e-9))

        # Apply the bijector: z <- z + u * t
        z_rows = [z_rows[d] + u[d] * t for d in range(dim)]

    z_out_ref[...] = jnp.concatenate(z_rows, axis=0)    # (dim, TB), lane-dense
    ld_ref[...] = jnp.concatenate(ld_rows, axis=0)      # (K, TB), lane-dense


def normalizing_flow_forward(z, weights, scales, biases, *, batch_tile=None):
    """z: (B, dim) f32; weights/scales: (K, dim); biases: (K, 1) or (K,).

    Returns (z_out, [log_det_0, ..., log_det_{K-1}]) with each log_det of
    shape (B, 1), matching the PyTorch module's (z, self.log_det) output.
    """
    B, dim = z.shape
    K = weights.shape[0]

    # Lane-aligned batch tile; pad B up to a multiple of the tile.
    if batch_tile is None:
        batch_tile = 512 if B >= 512 else 128
    TB = batch_tile
    B_pad = ((B + TB - 1) // TB) * TB

    # Transpose so batch maps to lanes; zero-pad the tail (harmless math there).
    z_t = jnp.zeros((dim, B_pad), jnp.float32).at[:, :B].set(
        z.T.astype(jnp.float32))

    # Flatten parameters to 1-D for SMEM (avoids 2-D SMEM padding).
    w_flat = weights.reshape(-1).astype(jnp.float32)   # (K*dim,)
    u_flat = scales.reshape(-1).astype(jnp.float32)    # (K*dim,)
    b_flat = biases.reshape(-1).astype(jnp.float32)    # (K,)

    grid = (B_pad // TB,)

    z_out_t, ld = pl.pallas_call(
        _planar_nf_kernel,
        out_shape=(
            jax.ShapeDtypeStruct((dim, B_pad), jnp.float32),
            jax.ShapeDtypeStruct((K, B_pad), jnp.float32),
        ),
        grid=grid,
        in_specs=[
            pl.BlockSpec(memory_space=pltpu.MemorySpace.SMEM),   # weights (K*dim,)
            pl.BlockSpec(memory_space=pltpu.MemorySpace.SMEM),   # scales  (K*dim,)
            pl.BlockSpec(memory_space=pltpu.MemorySpace.SMEM),   # biases  (K,)
            pl.BlockSpec((dim, TB), lambda i: (0, i)),           # z batch tile
        ],
        out_specs=(
            pl.BlockSpec((dim, TB), lambda i: (0, i)),           # z_out tile
            pl.BlockSpec((K, TB), lambda i: (0, i)),             # log_det tile
        ),
        compiler_params=pltpu.CompilerParams(
            dimension_semantics=("parallel",)),                  # v7x: 2 TCs
    )(w_flat, u_flat, b_flat, z_t)

    # Back to the module's layout, done once in the wrapper (outside the kernel).
    z_out = z_out_t[:, :B].T.astype(z.dtype)
    log_dets = [ld[k, :B].reshape(B, 1) for k in range(K)]
    return z_out, log_dets


def _reference_forward(z, weights, scales, biases):
    """Pure-JAX reference mirroring the PyTorch forward, for validation."""
    log_dets = []
    for k in range(weights.shape[0]):
        w, u, b = weights[k:k + 1], scales[k:k + 1], biases[k:k + 1]
        f_z = z @ w.T + b
        t = jnp.tanh(f_z)
        psi = (1.0 - t ** 2) * w
        det_grad = 1.0 + psi @ u.T
        log_dets.append(jnp.log(jnp.abs(det_grad) + 1e-9))
        z = z + u * t
    return z, log_dets


if __name__ == "__main__":
    # Module config: dim=2 (2-D flows), blocks=[PlanarFlow], flow_length=4 -> K=4 flows.
    dim = 2
    flow_length = 4
    n_blocks = 1
    K = flow_length * n_blocks
    batch = 16

    key = jax.random.PRNGKey(0)
    kz, kw, ku, kb = jax.random.split(key, 4)

    # Deterministic parameter init (PlanarFlow.init_parameters: uniform(-0.01, 0.01)).
    weights = jax.random.uniform(kw, (K, dim), jnp.float32, -0.01, 0.01)
    scales = jax.random.uniform(ku, (K, dim), jnp.float32, -0.01, 0.01)
    biases = jax.random.uniform(kb, (K, 1), jnp.float32, -0.01, 0.01)

    # Base-density sample (standard normal), as would be drawn from `density`.
    z = jax.random.normal(kz, (batch, dim), jnp.float32)

    z_out, log_dets = normalizing_flow_forward(z, weights, scales, biases)
    jax.block_until_ready(z_out)
    jax.block_until_ready(log_dets)

    # Validate against the pure-JAX reference of the PyTorch forward.
    z_ref, ld_ref = _reference_forward(z, weights, scales, biases)
    assert jnp.allclose(z_out, z_ref, atol=1e-5), "z mismatch"
    for a, b in zip(log_dets, ld_ref):
        assert a.shape == (batch, 1)
        assert jnp.allclose(a, b, atol=1e-5), "log_det mismatch"

    print("KERNEL_OK")
</pallas_src>

<mosaic_0001>
module attributes {stable_mosaic.version = 11 : i64} {
  func.func @_planar_nf_kernel(%arg0: i32, %arg1: memref<8xf32, #tpu.memory_space<smem>>, %arg2: memref<8xf32, #tpu.memory_space<smem>>, %arg3: memref<4xf32, #tpu.memory_space<smem>>, %arg4: memref<2x128xf32, #tpu.memory_space<vmem>>, %arg5: memref<2x128xf32, #tpu.memory_space<vmem>>, %arg6: memref<4x128xf32, #tpu.memory_space<vmem>>) attributes {dimension_semantics = [#tpu.dimension_semantics<parallel>], iteration_bounds = array<i64: 1>, scalar_prefetch = 0 : i64, scratch_operands = 0 : i64, tpu.core_type = #tpu.core_type<tc>, window_params = [{transform_indices = @transform_0, window_bounds = array<i64: 8>}, {transform_indices = @transform_1, window_bounds = array<i64: 8>}, {transform_indices = @transform_2, window_bounds = array<i64: 4>}, {transform_indices = @transform_3, window_bounds = array<i64: 2, 128>}, {transform_indices = @transform_4, window_bounds = array<i64: 2, 128>}, {transform_indices = @transform_5, window_bounds = array<i64: 4, 128>}]} {
    %c0 = arith.constant 0 : index
    %c0_0 = arith.constant 0 : index
    %0 = vector.load %arg4[%c0, %c0_0] : memref<2x128xf32, #tpu.memory_space<vmem>>, vector<1x128xf32>
    %c1 = arith.constant 1 : index
    %c0_1 = arith.constant 0 : index
    %1 = vector.load %arg4[%c1, %c0_1] : memref<2x128xf32, #tpu.memory_space<vmem>>, vector<1x128xf32>
    %c0_2 = arith.constant 0 : index
    %2 = memref.load %arg1[%c0_2] : memref<8xf32, #tpu.memory_space<smem>>
    %c1_3 = arith.constant 1 : index
    %3 = memref.load %arg1[%c1_3] : memref<8xf32, #tpu.memory_space<smem>>
    %c0_4 = arith.constant 0 : index
    %4 = memref.load %arg2[%c0_4] : memref<8xf32, #tpu.memory_space<smem>>
    %c1_5 = arith.constant 1 : index
    %5 = memref.load %arg2[%c1_5] : memref<8xf32, #tpu.memory_space<smem>>
    %c0_6 = arith.constant 0 : index
    %6 = memref.load %arg3[%c0_6] : memref<4xf32, #tpu.memory_space<smem>>
    %7 = vector.broadcast %2 : f32 to vector<1x128xf32>
    %8 = arith.mulf %7, %0 : vector<1x128xf32>
    %9 = vector.broadcast %3 : f32 to vector<1x128xf32>
    %10 = arith.mulf %9, %1 : vector<1x128xf32>
    %11 = arith.addf %8, %10 : vector<1x128xf32>
    %12 = vector.broadcast %6 : f32 to vector<1x128xf32>
    %13 = arith.addf %11, %12 : vector<1x128xf32>
    %14 = math.tanh %13 : vector<1x128xf32>
    %15 = arith.mulf %2, %4 : f32
    %16 = arith.mulf %3, %5 : f32
    %17 = arith.addf %15, %16 : f32
    %18 = arith.mulf %14, %14 : vector<1x128xf32>
    %cst = arith.constant 1.000000e+00 : f32
    %19 = vector.broadcast %cst : f32 to vector<1x128xf32>
    %20 = arith.subf %19, %18 : vector<1x128xf32>
    %21 = vector.broadcast %17 : f32 to vector<1x128xf32>
    %22 = arith.mulf %20, %21 : vector<1x128xf32>
    %cst_7 = arith.constant 1.000000e+00 : f32
    %23 = vector.broadcast %cst_7 : f32 to vector<1x128xf32>
    %24 = arith.addf %23, %22 : vector<1x128xf32>
    %25 = math.absf %24 : vector<1x128xf32>
    %cst_8 = arith.constant 9.99999971E-10 : f32
    %26 = vector.broadcast %cst_8 : f32 to vector<1x128xf32>
    %27 = arith.addf %25, %26 : vector<1x128xf32>
    %28 = math.log %27 : vector<1x128xf32>
    %29 = vector.broadcast %4 : f32 to vector<1x128xf32>
    %30 = arith.mulf %29, %14 : vector<1x128xf32>
    %31 = arith.addf %0, %30 : vector<1x128xf32>
    %32 = vector.broadcast %5 : f32 to vector<1x128xf32>
    %33 = arith.mulf %32, %14 : vector<1x128xf32>
    %34 = arith.addf %1, %33 : vector<1x128xf32>
    %c2 = arith.constant 2 : index
    %35 = memref.load %arg1[%c2] : memref<8xf32, #tpu.memory_space<smem>>
    %c3 = arith.constant 3 : index
    %36 = memref.load %arg1[%c3] : memref<8xf32, #tpu.memory_space<smem>>
    %c2_9 = arith.constant 2 : index
    %37 = memref.load %arg2[%c2_9] : memref<8xf32, #tpu.memory_space<smem>>
    %c3_10 = arith.constant 3 : index
    %38 = memref.load %arg2[%c3_10] : memref<8xf32, #tpu.memory_space<smem>>
    %c1_11 = arith.constant 1 : index
    %39 = memref.load %arg3[%c1_11] : memref<4xf32, #tpu.memory_space<smem>>
    %40 = vector.broadcast %35 : f32 to vector<1x128xf32>
    %41 = arith.mulf %40, %31 : vector<1x128xf32>
    %42 = vector.broadcast %36 : f32 to vector<1x128xf32>
    %43 = arith.mulf %42, %34 : vector<1x128xf32>
    %44 = arith.addf %41, %43 : vector<1x128xf32>
    %45 = vector.broadcast %39 : f32 to vector<1x128xf32>
    %46 = arith.addf %44, %45 : vector<1x128xf32>
    %47 = math.tanh %46 : vector<1x128xf32>
    %48 = arith.mulf %35, %37 : f32
    %49 = arith.mulf %36, %38 : f32
    %50 = arith.addf %48, %49 : f32
    %51 = arith.mulf %47, %47 : vector<1x128xf32>
    %cst_12 = arith.constant 1.000000e+00 : f32
    %52 = vector.broadcast %cst_12 : f32 to vector<1x128xf32>
    %53 = arith.subf %52, %51 : vector<1x128xf32>
    %54 = vector.broadcast %50 : f32 to vector<1x128xf32>
    %55 = arith.mulf %53, %54 : vector<1x128xf32>
    %cst_13 = arith.constant 1.000000e+00 : f32
    %56 = vector.broadcast %cst_13 : f32 to vector<1x128xf32>
    %57 = arith.addf %56, %55 : vector<1x128xf32>
    %58 = math.absf %57 : vector<1x128xf32>
    %cst_14 = arith.constant 9.99999971E-10 : f32
    %59 = vector.broadcast %cst_14 : f32 to vector<1x128xf32>
    %60 = arith.addf %58, %59 : vector<1x128xf32>
    %61 = math.log %60 : vector<1x128xf32>
    %62 = vector.broadcast %37 : f32 to vector<1x128xf32>
    %63 = arith.mulf %62, %47 : vector<1x128xf32>
    %64 = arith.addf %31, %63 : vector<1x128xf32>
    %65 = vector.broadcast %38 : f32 to vector<1x128xf32>
    %66 = arith.mulf %65, %47 : vector<1x128xf32>
    %67 = arith.addf %34, %66 : vector<1x128xf32>
    %c4 = arith.constant 4 : index
    %68 = memref.load %arg1[%c4] : memref<8xf32, #tpu.memory_space<smem>>
    %c5 = arith.constant 5 : index
    %69 = memref.load %arg1[%c5] : memref<8xf32, #tpu.memory_space<smem>>
    %c4_15 = arith.constant 4 : index
    %70 = memref.load %arg2[%c4_15] : memref<8xf32, #tpu.memory_space<smem>>
    %c5_16 = arith.constant 5 : index
    %71 = memref.load %arg2[%c5_16] : memref<8xf32, #tpu.memory_space<smem>>
    %c2_17 = arith.constant 2 : index
    %72 = memref.load %arg3[%c2_17] : memref<4xf32, #tpu.memory_space<smem>>
    %73 = vector.broadcast %68 : f32 to vector<1x128xf32>
    %74 = arith.mulf %73, %64 : vector<1x128xf32>
    %75 = vector.broadcast %69 : f32 to vector<1x128xf32>
    %76 = arith.mulf %75, %67 : vector<1x128xf32>
    %77 = arith.addf %74, %76 : vector<1x128xf32>
    %78 = vector.broadcast %72 : f32 to vector<1x128xf32>
    %79 = arith.addf %77, %78 : vector<1x128xf32>
    %80 = math.tanh %79 : vector<1x128xf32>
    %81 = arith.mulf %68, %70 : f32
    %82 = arith.mulf %69, %71 : f32
    %83 = arith.addf %81, %82 : f32
    %84 = arith.mulf %80, %80 : vector<1x128xf32>
    %cst_18 = arith.constant 1.000000e+00 : f32
    %85 = vector.broadcast %cst_18 : f32 to vector<1x128xf32>
    %86 = arith.subf %85, %84 : vector<1x128xf32>
    %87 = vector.broadcast %83 : f32 to vector<1x128xf32>
    %88 = arith.mulf %86, %87 : vector<1x128xf32>
    %cst_19 = arith.constant 1.000000e+00 : f32
    %89 = vector.broadcast %cst_19 : f32 to vector<1x128xf32>
    %90 = arith.addf %89, %88 : vector<1x128xf32>
    %91 = math.absf %90 : vector<1x128xf32>
    %cst_20 = arith.constant 9.99999971E-10 : f32
    %92 = vector.broadcast %cst_20 : f32 to vector<1x128xf32>
    %93 = arith.addf %91, %92 : vector<1x128xf32>
    %94 = math.log %93 : vector<1x128xf32>
    %95 = vector.broadcast %70 : f32 to vector<1x128xf32>
    %96 = arith.mulf %95, %80 : vector<1x128xf32>
    %97 = arith.addf %64, %96 : vector<1x128xf32>
    %98 = vector.broadcast %71 : f32 to vector<1x128xf32>
    %99 = arith.mulf %98, %80 : vector<1x128xf32>
    %100 = arith.addf %67, %99 : vector<1x128xf32>
    %c6 = arith.constant 6 : index
    %101 = memref.load %arg1[%c6] : memref<8xf32, #tpu.memory_space<smem>>
    %c7 = arith.constant 7 : index
    %102 = memref.load %arg1[%c7] : memref<8xf32, #tpu.memory_space<smem>>
    %c6_21 = arith.constant 6 : index
    %103 = memref.load %arg2[%c6_21] : memref<8xf32, #tpu.memory_space<smem>>
    %c7_22 = arith.constant 7 : index
    %104 = memref.load %arg2[%c7_22] : memref<8xf32, #tpu.memory_space<smem>>
    %c3_23 = arith.constant 3 : index
    %105 = memref.load %arg3[%c3_23] : memref<4xf32, #tpu.memory_space<smem>>
    %106 = vector.broadcast %101 : f32 to vector<1x128xf32>
    %107 = arith.mulf %106, %97 : vector<1x128xf32>
    %108 = vector.broadcast %102 : f32 to vector<1x128xf32>
    %109 = arith.mulf %108, %100 : vector<1x128xf32>
    %110 = arith.addf %107, %109 : vector<1x128xf32>
    %111 = vector.broadcast %105 : f32 to vector<1x128xf32>
    %112 = arith.addf %110, %111 : vector<1x128xf32>
    %113 = math.tanh %112 : vector<1x128xf32>
    %114 = arith.mulf %101, %103 : f32
    %115 = arith.mulf %102, %104 : f32
    %116 = arith.addf %114, %115 : f32
    %117 = arith.mulf %113, %113 : vector<1x128xf32>
    %cst_24 = arith.constant 1.000000e+00 : f32
    %118 = vector.broadcast %cst_24 : f32 to vector<1x128xf32>
    %119 = arith.subf %118, %117 : vector<1x128xf32>
    %120 = vector.broadcast %116 : f32 to vector<1x128xf32>
    %121 = arith.mulf %119, %120 : vector<1x128xf32>
    %cst_25 = arith.constant 1.000000e+00 : f32
    %122 = vector.broadcast %cst_25 : f32 to vector<1x128xf32>
    %123 = arith.addf %122, %121 : vector<1x128xf32>
    %124 = math.absf %123 : vector<1x128xf32>
    %cst_26 = arith.constant 9.99999971E-10 : f32
    %125 = vector.broadcast %cst_26 : f32 to vector<1x128xf32>
    %126 = arith.addf %124, %125 : vector<1x128xf32>
    %127 = math.log %126 : vector<1x128xf32>
    %128 = vector.broadcast %103 : f32 to vector<1x128xf32>
    %129 = arith.mulf %128, %113 : vector<1x128xf32>
    %130 = arith.addf %97, %129 : vector<1x128xf32>
    %131 = vector.broadcast %104 : f32 to vector<1x128xf32>
    %132 = arith.mulf %131, %113 : vector<1x128xf32>
    %133 = arith.addf %100, %132 : vector<1x128xf32>
    %134 = tpu.concatenate %130, %133 in 0 : vector<1x128xf32>, vector<1x128xf32> -> vector<2x128xf32>
    %c0_27 = arith.constant 0 : index
    %c0_28 = arith.constant 0 : index
    %135 = vector.load %arg5[%c0_27, %c0_28] : memref<2x128xf32, #tpu.memory_space<vmem>>, vector<2x128xf32>
    tpu.vector_store %arg5[%c0_27, %c0_28], %134 {strides = array<i32>} : memref<2x128xf32, #tpu.memory_space<vmem>>, vector<2x128xf32>,
    %136 = tpu.concatenate %28, %61, %94, %127 in 0 : vector<1x128xf32>, vector<1x128xf32>, vector<1x128xf32>, vector<1x128xf32> -> vector<4x128xf32>
    %c0_29 = arith.constant 0 : index
    %c0_30 = arith.constant 0 : index
    %137 = vector.load %arg6[%c0_29, %c0_30] : memref<4x128xf32, #tpu.memory_space<vmem>>, vector<4x128xf32>
    tpu.vector_store %arg6[%c0_29, %c0_30], %136 {strides = array<i32>} : memref<4x128xf32, #tpu.memory_space<vmem>>, vector<4x128xf32>,
    return
  }
  func.func @transform_0(%arg0: i32) -> i32 {
    %c0_i32 = arith.constant 0 : i32
    %c0_i32_0 = arith.constant 0 : i32
    return %c0_i32 : i32
  }
  func.func @transform_1(%arg0: i32) -> i32 {
    %c0_i32 = arith.constant 0 : i32
    %c0_i32_0 = arith.constant 0 : i32
    return %c0_i32 : i32
  }
  func.func @transform_2(%arg0: i32) -> i32 {
    %c0_i32 = arith.constant 0 : i32
    %c0_i32_0 = arith.constant 0 : i32
    return %c0_i32 : i32
  }
  func.func @transform_3(%arg0: i32) -> (i32, i32) {
    %c0_i32 = arith.constant 0 : i32
    %c0_i32_0 = arith.constant 0 : i32
    return %c0_i32, %arg0 : i32, i32
  }
  func.func @transform_4(%arg0: i32) -> (i32, i32) {
    %c0_i32 = arith.constant 0 : i32
    %c0_i32_0 = arith.constant 0 : i32
    return %c0_i32, %arg0 : i32, i32
  }
  func.func @transform_5(%arg0: i32) -> (i32, i32) {
    %c0_i32 = arith.constant 0 : i32
    %c0_i32_0 = arith.constant 0 : i32
    return %c0_i32, %arg0 : i32, i32
  }
}

</mosaic_0001>

<bundles_post_ra>
// kernel: tpu_custom_call.1
= control target key start
LH: loop header
LB: loop body
LE: loop exit
PB: predicated region body
PF: predicated region fallthrough
CT: control target
= control target key end

     0   :  { %11 = vsyncpa [#allocation4], 0  ;;  %s433_s0 = inlined_call_operand.hbm [shape: f32[8], index: 0, kind: input, shape index: {}]   ;;  %s434_s1 = inlined_call_operand.vmem [shape: f32[8], index: 1, kind: input, shape index: {}]   ;;  %s435_s2 = inlined_call_operand.hbm [shape: f32[4], index: 2, kind: input, shape index: {}]   ;;  %s436_s3 = inlined_call_operand.vmem [shape: f32[2,128], index: 3, kind: input, shape index: {}]   ;;  %s437_s4 = inlined_call_operand.hbm [shape: f32[2,128], index: 4, kind: output, shape index: {0}]   ;;  %s438_s5 = inlined_call_operand.hbm [shape: f32[4,128], index: 5, kind: output, shape index: {1}]  }
   0x1   :  { %12 = vsyncpa [#allocation5], 0 }
   0x2   :  { %13 = vsyncpa [#allocation8], 0 }
   0x3   :  { %14 = vsyncpa [#allocation3], 0 }
   0x4   :  { %15 = vsyncpa [#allocation11], 0  ;;  %s30_s20 = sshll.u32 %s434_s1, 4  ;;  %s348_s21 = smov [#allocation2]   ;;  %s31_s20 = int_to_ptr.vmem [resolvable:$true] %s30_s20 }
   0x5   :  { %23 = dma.hbm_to_smem %s433_s0, 16, %s348_s21, [#allocation4]  }
   0x6   :  { %s278_s24 = scalar_lea.vmem %s31_s20, 16  ;;  %p283_p1 = scmp.lt.s32.totalorder %s31_s20, %s31_s20 }
   0x7   :  { %p279_p0 = scmp.ne.s32.totalorder %s31_s20, %s278_s24  ;;  %p284_p2 = scmp.lt.s32.totalorder %s278_s24, %s278_s24 }
   0x9   :  { %p285_p3 = por %p284_p2, %p283_p1 }
   0xb   :  { %p286_p4 = pnand %p285_p3, %p279_p0 }
   0xd   :  { %289 = shalt.err (!%p286_p4)
}
   0xe   :  { %s349_s25 = smov [#allocation6]   ;;  %s350_s26 = smov [#allocation7]  }
   0xf   :  { %33 = dma.vmem_to_smem %s31_s20, 16, %s349_s25, [#allocation5]  }
  0x10   :  { %41 = dma.hbm_to_smem %s435_s2, 16, %s350_s26, [#allocation8]  }
  0x11   :  { %338 = dma.done.wait [#allocation4], 16  }
  0x12   :  { %339 = vsyncadd [#allocation4], 4294967280 }
  0x13   :  { %340 = dma.done.wait [#allocation5], 16  }
  0x14   :  { %341 = vsyncadd [#allocation5], 4294967280 }
  0x15   :  { %342 = dma.done.wait [#allocation8], 16  }
  0x16   :  { %343 = vsyncadd [#allocation8], 4294967280 }
  0x17   :  { %53 = sfence }
  0x18   :  { %s56_s0 = sld [smem:[#allocation2]]  ;;  %v54_v0 = vld [vmem:[%s436_s3] sm:$0x1]  ;;  %v55_v1 = vld [vmem:[%s436_s3 + $0x1] sm:$0x1]  ;;  %vm183_vm0 = vcmask 1040384  }
  0x19   :  { %s232_s1 = sld [smem:[#allocation2 + $0x1]]  ;;  %s351_s9 = smov [#allocation9]  }
  0x1a   :  { %s58_s29 = sld [smem:[#allocation6]]  ;;  %s207_s10 = sshll.u32 %s351_s9, 4  ;;  %s208_s10 = int_to_ptr.vmem [resolvable:$true] %s207_s10 }
  0x1b   :  { %s233_s30 = sld [smem:[#allocation6 + $0x1]]  ;;  %p303_p6 = scmp.lt.s32.totalorder %s208_s10, %s208_s10 }
  0x1c   :  { %s60_s8 = sld [smem:[#allocation7]] }
  0x1d   :  { %s234_s2 = sld [smem:[#allocation2 + $0x2]] }
  0x1e   :  { %v61_v2 = vstv %s56_s0  ;;  %s235_s12 = sld [smem:[#allocation2 + $0x3]] }
  0x1f   :  { %v62_v3 = vmul.f32 %v61_v2, %v54_v0  ;;  %v63_v4 = vstv %s232_s1  ;;  %s398_s14 = sld [smem:[#allocation6 + $0x2]] }
  0x20   :  { %v64_v5 = vmul.f32 %v63_v4, %v55_v1  ;;  %s69_s11 = smul.f32 %s58_s29, %s56_s0  ;;  %s400_s15 = sld [smem:[#allocation6 + $0x3]]  ;;  %v81_v9 = vstv %s58_s29 }
  0x21   :  { %s70_s13 = smul.f32 %s233_s30, %s232_s1  ;;  %v84_v10 = vstv %s233_s30  ;;  %s238_s19 = sld [smem:[#allocation7 + $0x1]] }
  0x22   :  { %v65_v6 = vadd.f32 %v64_v5, %v62_v3  ;;  %v66_v7 = vstv %s60_s8  ;;  %s406_s20 = sld [smem:[#allocation2 + $0x4]] }
  0x23   :  { %s71_s17 = sadd.f32 %s70_s13, %s69_s11  ;;  %v92_v15 = vstv %s234_s2 }
  0x24   :  { %v67_v8 = vadd.f32 %v66_v7, %v65_v6  ;;  %v94_v16 = vstv %s235_s12  ;;  %s408_s21 = sld [smem:[#allocation2 + $0x5]] }
  0x25   :  { %s100_s16 = smul.f32 %s398_s14, %s234_s2  ;;  %v74_v17 = vstv %s71_s17  ;;  %v112_v27 = vstv %s398_s14  ;;  %s243_s22 = sld [smem:[#allocation7 + $0x2]] }
  0x26   :  { %254 = vtanh.f32 %v67_v8  ;;  %s101_s3 = smul.f32 %s400_s15, %s235_s12  ;;  %v115_v28 = vstv %s400_s15  ;;  %s241_s23 = sld [smem:[#allocation6 + $0x4]] }
  0x27   :  { %v97_v24 = vstv %s238_s19  ;;  %s242_s24 = sld [smem:[#allocation6 + $0x5]]  ;;  %s298_s2 = scalar_lea.vmem %s208_s10, 32 }
  0x28   :  { %s404_s18 = sadd.f32 %s101_s3, %s100_s16  ;;  %v123_v34 = vstv %s406_s20  ;;  %p299_p5 = scmp.ne.s32.totalorder %s208_s10, %s298_s2 }
  0x29   :  { %s415_s25 = sld [smem:[#allocation2 + $0x6]]  ;;  %p304_p7 = scmp.lt.s32.totalorder %s298_s2, %s298_s2 }
  0x2a   :  { %v125_v35 = vstv %s408_s21  ;;  %v105_v37 = vstv %s404_s18  ;;  %s417_s26 = sld [smem:[#allocation2 + $0x7]] }
  0x2b   :  { %v128_v44 = vstv %s243_s22  ;;  %s248_s27 = sld [smem:[#allocation7 + $0x3]]  ;;  %p305_p8 = por %p304_p7, %p303_p6 }
  0x2c   :  { %v143_v51 = vstv %s241_s23  ;;  %s131_s28 = smul.f32 %s241_s23, %s406_s20  ;;  %s246_s29 = sld [smem:[#allocation6 + $0x6]] }
  0x2d   :  { %v146_v52 = vstv %s242_s24  ;;  %s132_s0 = smul.f32 %s242_s24, %s408_s21  ;;  %s247_s30 = sld [smem:[#allocation6 + $0x7]] }
  0x2e   :  { %p306_p9 = pnand %p305_p8, %p299_p5 }
  0x2f   :  { %v154_v58 = vstv %s415_s25  ;;  %s133_s1 = sadd.f32 %s132_s0, %s131_s28 }
  0x30   :  { %v156_v59 = vstv %s417_s26 }
  0x31   :  { %v159_v4 = vstv %s248_s27 }
  0x32   :  { %s162_s6 = smul.f32 %s246_s29, %s415_s25 }
  0x33   :  { %v255_v11 = vpop.eup %254  ;;  %s163_s7 = smul.f32 %s247_s30, %s417_s26 }
  0x34   :  { %v82_v12 = vmul.f32 %v255_v11, %v81_v9  ;;  %v85_v13 = vmul.f32 %v255_v11, %v84_v10  ;;  %v72_v14 = vmul.f32 %v255_v11, %v255_v11  ;;  %v136_v9 = vstv %s133_s1 }
  0x35   :  { %s164_s8 = sadd.f32 %s163_s7, %s162_s6 }
  0x36   :  { %v83_v18 = vadd.f32 %v82_v12, %v54_v0  ;;  %v86_v19 = vadd.f32 %v85_v13, %v55_v1  ;;  %v73_v20 = vsub.f32 1.0, %v72_v14  ;;  %v174_v13 = vstv %s246_s29 }
  0x37   :  { %v177_v14 = vstv %s247_s30 }
  0x38   :  { %v93_v21 = vmul.f32 %v92_v15, %v83_v18  ;;  %v95_v22 = vmul.f32 %v94_v16, %v86_v19  ;;  %v75_v23 = vmul.f32 %v74_v17, %v73_v20  ;;  %v167_v20 = vstv %s164_s8 }
  0x3a   :  { %v96_v25 = vadd.f32 %v95_v22, %v93_v21  ;;  %v76_v29 = vadd.f32 1.0, %v75_v23 }
  0x3c   :  { %v98_v26 = vadd.f32 %v97_v24, %v96_v25  ;;  %v77_v36 = vand.u32 2147483647, %v76_v29 }
  0x3e   :  { %256 = vtanh.f32 %v98_v26  ;;  %v78_v45 = vadd.f32 1e-09, %v77_v36 }
  0x40   :  { %258 = vlog2.f32 %v78_v45 }
  0x4b   :  { %v257_v30 = vpop.eup %256 }
  0x4c   :  { %v113_v31 = vmul.f32 %v257_v30, %v112_v27  ;;  %v116_v32 = vmul.f32 %v257_v30, %v115_v28  ;;  %v103_v33 = vmul.f32 %v257_v30, %v257_v30 }
  0x4d   :  { %v259_v53 = vpop.eup %258 }
  0x4e   :  { %v114_v38 = vadd.f32 %v113_v31, %v83_v18  ;;  %v117_v39 = vadd.f32 %v116_v32, %v86_v19  ;;  %v104_v40 = vsub.f32 1.0, %v103_v33  ;;  %v80_v62 = vmul.f32 0.6931472, %v259_v53 }
  0x50   :  { %v124_v41 = vmul.f32 %v123_v34, %v114_v38  ;;  %v126_v42 = vmul.f32 %v125_v35, %v117_v39  ;;  %v106_v43 = vmul.f32 %v105_v37, %v104_v40 }
  0x52   :  { %v127_v46 = vadd.f32 %v126_v42, %v124_v41  ;;  %v107_v47 = vadd.f32 1.0, %v106_v43 }
  0x54   :  { %v129_v48 = vadd.f32 %v128_v44, %v127_v46  ;;  %v108_v49 = vand.u32 2147483647, %v107_v47 }
  0x56   :  { %260 = vtanh.f32 %v129_v48  ;;  %v109_v50 = vadd.f32 1e-09, %v108_v49 }
  0x58   :  { %262 = vlog2.f32 %v109_v50 }
  0x63   :  { %v261_v54 = vpop.eup %260 }
  0x64   :  { %v144_v55 = vmul.f32 %v261_v54, %v143_v51  ;;  %v147_v56 = vmul.f32 %v261_v54, %v146_v52  ;;  %v134_v0 = vmul.f32 %v261_v54, %v261_v54 }
  0x65   :  { %v263_v57 = vpop.eup %262 }
  0x66   :  { %v145_v60 = vadd.f32 %v144_v55, %v114_v38  ;;  %v148_v61 = vadd.f32 %v147_v56, %v117_v39  ;;  %v111_v63 = vmul.f32 0.6931472, %v263_v57  ;;  %v135_v7 = vsub.f32 1.0, %v134_v0 }
  0x68   :  { %v155_v1 = vmul.f32 %v154_v58, %v145_v60  ;;  %v157_v2 = vmul.f32 %v156_v59, %v148_v61  ;;  %v187_v3 = vrot.slane %v111_v63, 7  ;;  %v137_v10 = vmul.f32 %v136_v9, %v135_v7 }
  0x6a   :  { %v158_v5 = vadd.f32 %v157_v2, %v155_v1  ;;  %v195_v6 = vsel %vm183_vm0, %v80_v62, %v187_v3  ;;  %v138_v11 = vadd.f32 1.0, %v137_v10 }
  0x6c   :  { %v160_v8 = vadd.f32 %v159_v4, %v158_v5  ;;  %v139_v12 = vand.u32 2147483647, %v138_v11 }
  0x6e   :  { %264 = vtanh.f32 %v160_v8  ;;  %v140_v16 = vadd.f32 1e-09, %v139_v12 }
  0x70   :  { %266 = vlog2.f32 %v140_v16 }
  0x7b   :  { %v265_v15 = vpop.eup %264 }
  0x7c   :  { %v175_v17 = vmul.f32 %v265_v15, %v174_v13  ;;  %v178_v18 = vmul.f32 %v265_v15, %v177_v14  ;;  %v165_v19 = vmul.f32 %v265_v15, %v265_v15 }
  0x7e   :  { %v176_v21 = vadd.f32 %v175_v17, %v145_v60  ;;  %v179_v22 = vadd.f32 %v178_v18, %v148_v61  ;;  %v166_v23 = vsub.f32 1.0, %v165_v19 }
  0x80   :  { %v181_v24 = vrot.slane %v179_v22, 7  ;;  %v168_v25 = vmul.f32 %v167_v20, %v166_v23 }
  0x82   :  { %v184_v26 = vsel %vm183_vm0, %v176_v21, %v181_v24  ;;  %v169_v27 = vadd.f32 1.0, %v168_v25 }
  0x83   :  { %185 = vst [vmem:[#allocation9] sm:$0x3] %v184_v26 }
  0x84   :  { %v170_v28 = vand.u32 2147483647, %v169_v27 }
  0x85   :  { %309 = shalt.err (!%p306_p9)
}
  0x86   :  { %210 = dma.vmem_to_hbm [thread:$0]  %s208_s10, 32, %s437_s4, [#allocation3]   ;;  %v171_v29 = vadd.f32 1e-09, %v170_v28  ;;  %v267_v30 = vpop.eup %266  ;;  %vm196_vm1 = vcmask 1041408   ;;  %vm198_vm2 = vcmask 1042432  }
  0x87   :  { %v142_v31 = vmul.f32 0.6931472, %v267_v30  ;;  %s352_s13 = smov [#allocation10]  }
  0x88   :  { %268 = vlog2.f32 %v171_v29  ;;  %s217_s14 = sshll.u32 %s352_s13, 4  ;;  %s218_s14 = int_to_ptr.vmem [resolvable:$true] %s217_s14 }
  0x89   :  { %v190_v32 = vrot.slane %v142_v31, 6  ;;  %s318_s15 = scalar_lea.vmem %s218_s14, 64  ;;  %p323_p11 = scmp.lt.s32.totalorder %s218_s14, %s218_s14 }
  0x8a   :  { %p319_p10 = scmp.ne.s32.totalorder %s218_s14, %s318_s15  ;;  %p324_p12 = scmp.lt.s32.totalorder %s318_s15, %s318_s15 }
  0x8b   :  { %v197_v35 = vsel %vm196_vm1, %v195_v6, %v190_v32 }
  0x8c   :  { %p325_p13 = por %p324_p12, %p323_p11 }
  0x8e   :  { %p326_p0 = pnand %p325_p13, %p319_p10 }
  0x95   :  { %v269_v33 = vpop.eup %268 }
  0x96   :  { %v173_v34 = vmul.f32 0.6931472, %v269_v33 }
  0x98   :  { %v193_v36 = vrot.slane %v173_v34, 5 }
  0x9a   :  { %v199_v37 = vsel %vm198_vm2, %v197_v35, %v193_v36 }
  0x9b   :  { %200 = vst [vmem:[#allocation10] sm:$0xf] %v199_v37 }
  0x9c   :  { %329 = shalt.err (!%p326_p0)
}
  0x9d   :  { %220 = dma.vmem_to_hbm [thread:$0]  %s218_s14, 64, %s438_s5, [#allocation11]  }
  0x9e   :  { %344 = dma.done.wait [#allocation3], 32  }
  0x9f   :  { %345 = vsyncadd [#allocation3], 4294967264 }
  0xa0   :  { %346 = dma.done.wait [#allocation11], 64  }
  0xa1   :  { %347 = vsyncadd [#allocation11], 4294967232 }
  0xa2   :  { %227 = vsyncpa [#allocation3], 1 }
  0xa3   :  { %228 = vsyncpa [#allocation11], 1 }
  0xa4   :  { %229 = vsyncpa [#allocation4], 1 }
  0xa5   :  { %230 = vsyncpa [#allocation8], 1 }
  0xa6   :  { %231 = vsyncpa [#allocation5], 1 }

</bundles_post_ra>
